<compile_context>
chip_gen: v7x
topology: tpu7x:2x2x1
jax: 0.10.0
libtpu: 0.0.40
codegen_flags: <defaults>
</compile_context>

<pallas_src>
import functools

import numpy as np
import jax
import jax.numpy as jnp
from jax.experimental import pallas as pl
from jax.experimental.pallas import tpu as pltpu


def _round_up(x, m):
    return (x + m - 1) // m * m


def textcnn_kernel(x_ref, wpack_ref, bpack_ref, mask_ref, fcw_ref, fcb_ref,
                   out_ref, *, n_taps, lop):
    # x_ref    : (TB, L_pad, E) bf16  embedded activations (no im2col in HBM)
    # wpack_ref: (KEp, Fp)      bf16  packed conv weights (zero rows past each bank's k*E)
    # bpack_ref: (1, Fp)        f32   packed conv bias
    # mask_ref : (LOP, Fp)      f32   1.0 on valid (time, filter-lane) positions
    # fcw_ref  : (Fp, Cp)       bf16  packed FC weight
    # fcb_ref  : (1, Cp)        f32   packed FC bias
    # out_ref  : (TB, Cp)       f32
    TB = x_ref.shape[0]
    KEp, Fp = wpack_ref.shape

    x = x_ref[...]                                            # whole tile in VMEM
    # Build the conv windows in VMEM from static shifted slices.  Taps past a bank's
    # kernel size (and the KE->KEp padding taps) hit zero weight rows, so whatever
    # data they carry contributes nothing.
    win = jnp.concatenate([x[:, i:i + lop, :] for i in range(n_taps)], axis=-1)
    win = win.reshape(TB * lop, KEp)                          # (TB*LOP, KEp) bf16

    # One MXU matmul for all three filter banks (K = KEp, lane-dense N = Fp).
    conv = jnp.dot(win, wpack_ref[...],
                   preferred_element_type=jnp.float32)        # (TB*LOP, Fp) f32
    conv = jnp.maximum(conv + bpack_ref[...], 0.0)            # bias + ReLU (VPU, f32)
    conv = conv.reshape(TB, lop, Fp) * mask_ref[...][None]    # zero invalid time slots
    pooled = jnp.max(conv, axis=1)                            # max-over-time (TB, Fp)

    # Dropout: identity at inference.  FC is a second lane-dense MXU matmul.
    logits = jnp.dot(pooled.astype(jnp.bfloat16), fcw_ref[...],
                     preferred_element_type=jnp.float32) + fcb_ref[...]
    out_ref[...] = logits


def pack_params(params, kernel_sizes=(3, 4, 5)):
    """One-time packing of TextCNN weights into a lane-dense, MXU-friendly layout."""
    emb = params['emb']
    E = emb.shape[1]
    F = params[f'w{kernel_sizes[0]}'].shape[2]
    C = params['fc_b'].shape[1]
    nb = len(kernel_sizes)
    kmax = max(kernel_sizes)

    Fp = _round_up(nb * F, 128)           # lane-dense packed filter dim
    Cp = _round_up(C, 128)                # lane-dense logit dim
    KE = kmax * E
    KEp = _round_up(KE, 128)              # pad contraction (v5e: 2 full 128-deep passes)
    if KEp % E != 0:                      # keep an integer number of taps
        KEp = KE
    n_taps = KEp // E

    w_pack = jnp.zeros((KEp, Fp), jnp.float32)
    b_pack = jnp.zeros((1, Fp), jnp.float32)
    for bidx, k in enumerate(kernel_sizes):
        off = bidx * F
        w = params[f'w{k}']                                   # (k, E, F)
        w_pack = w_pack.at[:k * E, off:off + F].set(w.reshape(k * E, F))
        b_pack = b_pack.at[:, off:off + F].set(params[f'b{k}'])

    fcw = jnp.zeros((Fp, Cp), jnp.float32).at[:nb * F, :C].set(params['fc_w'])
    fcb = jnp.zeros((1, Cp), jnp.float32).at[:, :C].set(params['fc_b'])

    return dict(
        emb=emb.astype(jnp.bfloat16),          # bf16 before the gather (opt #4)
        w_pack=w_pack.astype(jnp.bfloat16),
        b_pack=b_pack,
        fc_w=fcw.astype(jnp.bfloat16),
        fc_b=fcb,
        kernel_sizes=tuple(kernel_sizes),
        E=E, F=F, C=C, Fp=Fp, Cp=Cp, n_taps=n_taps,
    )


def textcnn_forward(ids, packed, batch_tile=256):
    B, L = ids.shape
    ks = packed['kernel_sizes']
    kmin, kmax = min(ks), max(ks)
    E, F, C = packed['E'], packed['F'], packed['C']
    Fp, Cp, n_taps = packed['Fp'], packed['Cp'], packed['n_taps']
    assert L >= kmax, "sequence shorter than largest conv kernel"

    L_out = L - kmin + 1                  # longest valid conv output
    LOP = _round_up(L_out, 8)             # aligned time dim for the pooled stage
    L_pad = LOP + n_taps - 1              # input rows needed by the in-kernel tap slices

    # Batch tiling: multiple of 8; cap so large batches always give >= 2 grid steps
    # (dimension_semantics=("parallel",) then shards across v7x's 2 TensorCores).
    TB = min(batch_tile, _round_up(B, 8))
    if B >= 16:
        TB = min(TB, _round_up((B + 1) // 2, 8))
    Bp = _round_up(B, TB)
    num_tiles = Bp // TB

    # ---- wrapper-side embedding gather (bf16) + zero time-tail; no im2col in HBM ----
    # TODO(synk): the data-dependent embedding gather stays in XLA (not expressible
    # as a rectangular BlockSpec window).
    ids_p = jnp.zeros((Bp, L), ids.dtype).at[:B].set(ids)     # padded rows use id 0
    x = jnp.take(packed['emb'], ids_p, axis=0)                # (Bp, L, E) bf16
    x = jnp.pad(x, ((0, 0), (0, L_pad - L), (0, 0)))          # (Bp, L_pad, E)

    # Valid-time mask, built from static shapes -> compile-time constant under jit.
    mask_np = np.zeros((LOP, Fp), np.float32)
    for bidx, k in enumerate(ks):
        mask_np[:L - k + 1, bidx * F:(bidx + 1) * F] = 1.0
    mask = jnp.asarray(mask_np)

    KEp = packed['w_pack'].shape[0]
    kernel = functools.partial(textcnn_kernel, n_taps=n_taps, lop=LOP)

    act_spec_kwargs = {}
    if num_tiles >= 3:                    # deeper buffering only pays with a long grid
        act_spec_kwargs['pipeline_mode'] = pl.Buffered(3)

    out = pl.pallas_call(
        kernel,
        out_shape=jax.ShapeDtypeStruct((Bp, Cp), jnp.float32),
        grid_spec=pltpu.PrefetchScalarGridSpec(
            num_scalar_prefetch=0,
            grid=(num_tiles,),
            in_specs=[
                pl.BlockSpec((TB, L_pad, E), lambda i: (i, 0, 0),
                             **act_spec_kwargs),               # activations
                pl.BlockSpec((KEp, Fp), lambda i: (0, 0)),      # packed conv W (resident)
                pl.BlockSpec((1, Fp), lambda i: (0, 0)),        # packed conv b
                pl.BlockSpec((LOP, Fp), lambda i: (0, 0)),      # valid-time mask
                pl.BlockSpec((Fp, Cp), lambda i: (0, 0)),       # packed fc W
                pl.BlockSpec((1, Cp), lambda i: (0, 0)),        # packed fc b
            ],
            out_specs=pl.BlockSpec((TB, Cp), lambda i: (i, 0)),
        ),
        compiler_params=pltpu.CompilerParams(
            dimension_semantics=("parallel",)),                 # shard grid across TCs
    )(x, packed['w_pack'], packed['b_pack'], mask, packed['fc_w'], packed['fc_b'])
    return out[:B, :C]


def textcnn_reference(ids, params, kernel_sizes=(3, 4, 5)):
    """Pure-JAX f32 reference matching the PyTorch forward (eval mode)."""
    x = jnp.take(params['emb'], ids, axis=0)                   # (B, L, E)
    pooled = []
    for k in kernel_sizes:
        w, b = params[f'w{k}'], params[f'b{k}']                # (k,E,F), (1,F)
        L_out = ids.shape[1] - k + 1
        acc = jnp.zeros((ids.shape[0], L_out, w.shape[2]), jnp.float32)
        for i in range(k):
            acc = acc + jnp.einsum('ble,ef->blf', x[:, i:i + L_out, :], w[i])
        acc = jnp.maximum(acc + b[0][None, None], 0.0)
        pooled.append(jnp.max(acc, axis=1))
    cat = jnp.concatenate(pooled, axis=1)
    return cat @ params['fc_w'] + params['fc_b']


def init_params(key, vocab_size, embed_dim, num_classes,
                kernel_sizes=(3, 4, 5), num_filters=16):
    keys = jax.random.split(key, 2 + 2 * len(kernel_sizes) + 2)
    ki = iter(keys)

    # nn.Embedding(vocab_size, embed_dim, padding_idx=0): row 0 is zero.
    emb = 0.02 * jax.random.normal(next(ki), (vocab_size, embed_dim), jnp.float32)
    emb = emb.at[0].set(0.0)

    params = {'emb': emb}
    for k in kernel_sizes:
        # PyTorch Conv2d weight (F, 1, k, E); stored here as (k, E, F).
        w = 0.02 * jax.random.normal(next(ki), (k, embed_dim, num_filters), jnp.float32)
        b = 0.01 * jax.random.normal(next(ki), (1, num_filters), jnp.float32)
        params[f'w{k}'] = w
        params[f'b{k}'] = b

    feat = num_filters * len(kernel_sizes)
    # PyTorch Linear weight (C, feat); stored transposed as (feat, C).
    params['fc_w'] = 0.02 * jax.random.normal(next(ki), (feat, num_classes), jnp.float32)
    params['fc_b'] = 0.01 * jax.random.normal(next(ki), (1, num_classes), jnp.float32)
    return params


if __name__ == "__main__":
    key = jax.random.PRNGKey(0)
    k_ids, k_params = jax.random.split(key)

    VOCAB, EMBED, CLASSES = 50, 32, 4
    BATCH, SEQ = 2, 16
    NUM_FILTERS = 16

    params = init_params(k_params, VOCAB, EMBED, CLASSES,
                         kernel_sizes=(3, 4, 5), num_filters=NUM_FILTERS)
    packed = pack_params(params, kernel_sizes=(3, 4, 5))
    input_ids = jax.random.randint(k_ids, (BATCH, SEQ), 0, VOCAB, dtype=jnp.int32)

    logits = textcnn_forward(input_ids, packed)
    jax.block_until_ready(logits)
    assert logits.shape == (BATCH, CLASSES), logits.shape

    ref = textcnn_reference(input_ids, params)
    assert jnp.allclose(logits, ref, atol=1e-2, rtol=1e-1), (logits, ref)
    print("KERNEL_OK")
</pallas_src>

<mosaic_0001>
module attributes {stable_mosaic.version = 11 : i64} {
  func.func @textcnn_kernel(%arg0: i32, %arg1: memref<8x23x32xbf16, #tpu.memory_space<vmem>>, %arg2: memref<256x128xbf16, #tpu.memory_space<vmem>>, %arg3: memref<1x128xf32, #tpu.memory_space<vmem>>, %arg4: memref<16x128xf32, #tpu.memory_space<vmem>>, %arg5: memref<128x128xbf16, #tpu.memory_space<vmem>>, %arg6: memref<1x128xf32, #tpu.memory_space<vmem>>, %arg7: memref<8x128xf32, #tpu.memory_space<vmem>>) attributes {dimension_semantics = [#tpu.dimension_semantics<parallel>], iteration_bounds = array<i64: 1>, scalar_prefetch = 0 : i64, scratch_operands = 0 : i64, tpu.core_type = #tpu.core_type<tc>, window_params = [{transform_indices = @transform_0, window_bounds = array<i64: 8, 23, 32>}, {pipeline_mode = #tpu.pipeline_mode<synchronous>, transform_indices = @transform_1, window_bounds = array<i64: 256, 128>}, {pipeline_mode = #tpu.pipeline_mode<synchronous>, transform_indices = @transform_2, window_bounds = array<i64: 1, 128>}, {pipeline_mode = #tpu.pipeline_mode<synchronous>, transform_indices = @transform_3, window_bounds = array<i64: 16, 128>}, {pipeline_mode = #tpu.pipeline_mode<synchronous>, transform_indices = @transform_4, window_bounds = array<i64: 128, 128>}, {pipeline_mode = #tpu.pipeline_mode<synchronous>, transform_indices = @transform_5, window_bounds = array<i64: 1, 128>}, {transform_indices = @transform_6, window_bounds = array<i64: 8, 128>}]} {
    %c0 = arith.constant 0 : index
    %c0_0 = arith.constant 0 : index
    %c0_1 = arith.constant 0 : index
    %0 = vector.load %arg1[%c0, %c0_0, %c0_1] : memref<8x23x32xbf16, #tpu.memory_space<vmem>>, vector<8x23x32xbf16>
    %1 = vector.extract_strided_slice %0 {offsets = [0, 0, 0], sizes = [8, 16, 32], strides = [1, 1, 1]} : vector<8x23x32xbf16> to vector<8x16x32xbf16>
    %2 = vector.extract_strided_slice %0 {offsets = [0, 1, 0], sizes = [8, 16, 32], strides = [1, 1, 1]} : vector<8x23x32xbf16> to vector<8x16x32xbf16>
    %3 = vector.extract_strided_slice %0 {offsets = [0, 2, 0], sizes = [8, 16, 32], strides = [1, 1, 1]} : vector<8x23x32xbf16> to vector<8x16x32xbf16>
    %4 = vector.extract_strided_slice %0 {offsets = [0, 3, 0], sizes = [8, 16, 32], strides = [1, 1, 1]} : vector<8x23x32xbf16> to vector<8x16x32xbf16>
    %5 = vector.extract_strided_slice %0 {offsets = [0, 4, 0], sizes = [8, 16, 32], strides = [1, 1, 1]} : vector<8x23x32xbf16> to vector<8x16x32xbf16>
    %6 = vector.extract_strided_slice %0 {offsets = [0, 5, 0], sizes = [8, 16, 32], strides = [1, 1, 1]} : vector<8x23x32xbf16> to vector<8x16x32xbf16>
    %7 = vector.extract_strided_slice %0 {offsets = [0, 6, 0], sizes = [8, 16, 32], strides = [1, 1, 1]} : vector<8x23x32xbf16> to vector<8x16x32xbf16>
    %8 = vector.extract_strided_slice %0 {offsets = [0, 7, 0], sizes = [8, 16, 32], strides = [1, 1, 1]} : vector<8x23x32xbf16> to vector<8x16x32xbf16>
    %9 = tpu.concatenate %1, %2, %3, %4, %5, %6, %7, %8 in 2 : vector<8x16x32xbf16>, vector<8x16x32xbf16>, vector<8x16x32xbf16>, vector<8x16x32xbf16>, vector<8x16x32xbf16>, vector<8x16x32xbf16>, vector<8x16x32xbf16>, vector<8x16x32xbf16> -> vector<8x16x256xbf16>
    %10 = vector.shape_cast %9 : vector<8x16x256xbf16> to vector<128x256xbf16>
    %c0_2 = arith.constant 0 : index
    %c0_3 = arith.constant 0 : index
    %11 = vector.load %arg2[%c0_2, %c0_3] : memref<256x128xbf16, #tpu.memory_space<vmem>>, vector<256x128xbf16>
    %cst = arith.constant dense<0.000000e+00> : vector<128x128xf32>
    %12 = tpu.matmul %10, %11, %cst {dimension_numbers = #tpu.dot_dimension_numbers<[1], [0], [0], [1], [0, 0, 1, 1], [], []>} : vector<128x256xbf16>, vector<256x128xbf16>, vector<128x128xf32> -> vector<128x128xf32>
    %c0_4 = arith.constant 0 : index
    %c0_5 = arith.constant 0 : index
    %13 = vector.load %arg3[%c0_4, %c0_5] : memref<1x128xf32, #tpu.memory_space<vmem>>, vector<1x128xf32>
    %14 = vector.broadcast %13 : vector<1x128xf32> to vector<128x128xf32>
    %15 = arith.addf %12, %14 : vector<128x128xf32>
    %cst_6 = arith.constant 0.000000e+00 : f32
    %16 = vector.broadcast %cst_6 : f32 to vector<128x128xf32>
    %17 = arith.maximumf %15, %16 : vector<128x128xf32>
    %18 = vector.shape_cast %17 : vector<128x128xf32> to vector<8x16x128xf32>
    %c0_7 = arith.constant 0 : index
    %c0_8 = arith.constant 0 : index
    %19 = vector.load %arg4[%c0_7, %c0_8] : memref<16x128xf32, #tpu.memory_space<vmem>>, vector<16x128xf32>
    %20 = vector.shape_cast %19 : vector<16x128xf32> to vector<1x16x128xf32>
    %21 = vector.broadcast %20 : vector<1x16x128xf32> to vector<8x16x128xf32>
    %22 = arith.mulf %18, %21 : vector<8x16x128xf32>
    %cst_9 = arith.constant dense<0xFF800000> : vector<8x128xf32>
    %23 = vector.multi_reduction <maximumf>, %22, %cst_9 [1] : vector<8x16x128xf32> to vector<8x128xf32>
    %24 = arith.truncf %23 : vector<8x128xf32> to vector<8x128xbf16>
    %c0_10 = arith.constant 0 : index
    %c0_11 = arith.constant 0 : index
    %25 = vector.load %arg5[%c0_10, %c0_11] : memref<128x128xbf16, #tpu.memory_space<vmem>>, vector<128x128xbf16>
    %cst_12 = arith.constant dense<0.000000e+00> : vector<8x128xf32>
    %26 = tpu.matmul %24, %25, %cst_12 {dimension_numbers = #tpu.dot_dimension_numbers<[1], [0], [0], [1], [0, 0, 1, 1], [], []>} : vector<8x128xbf16>, vector<128x128xbf16>, vector<8x128xf32> -> vector<8x128xf32>
    %c0_13 = arith.constant 0 : index
    %c0_14 = arith.constant 0 : index
    %27 = vector.load %arg6[%c0_13, %c0_14] : memref<1x128xf32, #tpu.memory_space<vmem>>, vector<1x128xf32>
    %28 = vector.broadcast %27 : vector<1x128xf32> to vector<8x128xf32>
    %29 = arith.addf %26, %28 : vector<8x128xf32>
    %c0_15 = arith.constant 0 : index
    %c0_16 = arith.constant 0 : index
    %30 = vector.load %arg7[%c0_15, %c0_16] : memref<8x128xf32, #tpu.memory_space<vmem>>, vector<8x128xf32>
    tpu.vector_store %arg7[%c0_15, %c0_16], %29 {strides = array<i32>} : memref<8x128xf32, #tpu.memory_space<vmem>>, vector<8x128xf32>,
    return
  }
  func.func @transform_0(%arg0: i32) -> (i32, i32, i32) {
    %c0_i32 = arith.constant 0 : i32
    %c0_i32_0 = arith.constant 0 : i32
    %c0_i32_1 = arith.constant 0 : i32
    return %arg0, %c0_i32, %c0_i32_0 : i32, i32, i32
  }
  func.func @transform_1(%arg0: i32) -> (i32, i32) {
    %c0_i32 = arith.constant 0 : i32
    %c0_i32_0 = arith.constant 0 : i32
    %c0_i32_1 = arith.constant 0 : i32
    return %c0_i32, %c0_i32_0 : i32, i32
  }
  func.func @transform_2(%arg0: i32) -> (i32, i32) {
    %c0_i32 = arith.constant 0 : i32
    %c0_i32_0 = arith.constant 0 : i32
    %c0_i32_1 = arith.constant 0 : i32
    return %c0_i32, %c0_i32_0 : i32, i32
  }
  func.func @transform_3(%arg0: i32) -> (i32, i32) {
    %c0_i32 = arith.constant 0 : i32
    %c0_i32_0 = arith.constant 0 : i32
    %c0_i32_1 = arith.constant 0 : i32
    return %c0_i32, %c0_i32_0 : i32, i32
  }
  func.func @transform_4(%arg0: i32) -> (i32, i32) {
    %c0_i32 = arith.constant 0 : i32
    %c0_i32_0 = arith.constant 0 : i32
    %c0_i32_1 = arith.constant 0 : i32
    return %c0_i32, %c0_i32_0 : i32, i32
  }
  func.func @transform_5(%arg0: i32) -> (i32, i32) {
    %c0_i32 = arith.constant 0 : i32
    %c0_i32_0 = arith.constant 0 : i32
    %c0_i32_1 = arith.constant 0 : i32
    return %c0_i32, %c0_i32_0 : i32, i32
  }
  func.func @transform_6(%arg0: i32) -> (i32, i32) {
    %c0_i32 = arith.constant 0 : i32
    %c0_i32_0 = arith.constant 0 : i32
    return %arg0, %c0_i32 : i32, i32
  }
}

</mosaic_0001>

<bundles_post_ra>
// kernel: tpu_custom_call.1
= control target key start
LH: loop header
LB: loop body
LE: loop exit
PB: predicated region body
PF: predicated region fallthrough
CT: control target
= control target key end

     0   :  { %11 = vsyncpa [#allocation3], 0  ;;  %s2017_s0 = inlined_call_operand.vmem [shape: bf16[8,23,32], index: 0, kind: input, shape index: {}]   ;;  %s2018_s1 = inlined_call_operand.vmem [shape: bf16[256,128], index: 1, kind: input, shape index: {}]   ;;  %s2019_s2 = inlined_call_operand.vmem [shape: f32[1,128], index: 2, kind: input, shape index: {}]   ;;  %s2020_s3 = inlined_call_operand.hbm [shape: f32[16,128], index: 3, kind: input, shape index: {}]   ;;  %s2021_s4 = inlined_call_operand.vmem [shape: bf16[128,128], index: 4, kind: input, shape index: {}]   ;;  %s2022_s5 = inlined_call_operand.vmem [shape: f32[1,128], index: 5, kind: input, shape index: {}]   ;;  %s2023_s6 = inlined_call_operand.hbm [shape: f32[8,128], index: 6, kind: output, shape index: {}]  }
   0x1   :  { %12 = vsyncpa [#allocation4], 0  ;;  %s1426_s21 = smov [#allocation2]   ;;  %s1378_s25 = scalar_lea.hbm %s2020_s3, 256 }
   0x2   :  { %s24_s22 = sshll.u32 %s1426_s21, 4  ;;  %p1379_p0 = scmp.ne.s32.totalorder %s2020_s3, %s1378_s25  ;;  %s25_s22 = int_to_ptr.vmem [resolvable:$true] %s24_s22 }
   0x3   :  { %p1382_p1 = scmp.lt.u32.totalorder %s1378_s25, %s2020_s3 }
   0x5   :  { %p1384_p2 = pnand %p1382_p1, %p1379_p0 }
   0x7   :  { %1387 = shalt.err (!%p1384_p2)
}
   0x8   :  { %s1388_s30 = scalar_lea.vmem %s25_s22, 256  ;;  %p1393_p4 = scmp.lt.s32.totalorder %s25_s22, %s25_s22 }
   0x9   :  { %p1389_p3 = scmp.ne.s32.totalorder %s25_s22, %s1388_s30  ;;  %p1394_p5 = scmp.lt.s32.totalorder %s1388_s30, %s1388_s30 }
   0xb   :  { %p1395_p6 = por %p1394_p5, %p1393_p4 }
   0xd   :  { %p1396_p7 = pnand %p1395_p6, %p1389_p3 }
   0xf   :  { %1399 = shalt.err (!%p1396_p7)
}
  0x10   :  { %s1427_s7 = smov 128   ;;  %s1428_s8 = smov 8  }
  0x11   :  { %30 = dma.hbm_to_vmem [thread:$0]  %s2020_s3, 256, %s25_s22, [#allocation3], %s1427_s7, %s1427_s7, %s1428_s8  }
  0x12   :  { %1422 = dma.done.wait [#allocation3], 256  }
  0x13   :  { %1423 = vsyncadd [#allocation3], 4294967040  ;;  %v1485_v0 = vld [vmem:[%s2017_s0 + $0xc] sm:$0xff]   ;;  %v1490_v1 = vld [vmem:[%s2017_s0 + $0x14] ss:$0 sps:$4 sm:$0xff]   ;;  %vm468_vm1 = vcmask 1044480  }
  0x14   :  { %vm395_vm0 = vsmask.f32 5376  ;;  %v1495_v2 = vld [vmem:[%s2017_s0] sm:$0xff]   ;;  %v472_v3 = vrot.slane %v1485_v0, 3  ;;  %v473_v4 = vrot.slane %v1490_v1, 3  ;;  %vm240_vm2 = vcmask 1046528  }
  0x15   :  { %v1502_v5 = vld [vmem:[%s2017_s0 + $0x8] ss:$0 sps:$4 sm:$0xff]   ;;  %v244_v6 = vrot.slane %v1485_v0, 1  ;;  %vm127_vm3 = vsmask.f32 7424  ;;  %v469_v7 = vrot.slane %v1495_v2, 3 }
  0x16   :  { %v241_v8 = vrot.slane %v1495_v2, 1  ;;  %v129_v9 = vshrl.u32 %v1495_v2, 16  ;;  %v131_v10 = vshll.u32 %v1495_v2, 16  ;;  %v474_v11 = vsel %vm468_vm1, %v472_v3, %v473_v4  ;;  %s1429_s18 = smov 64   ;;  %s1430_s19 = smov 32   ;;  %v1536_v55 = vld [vmem:[%s2017_s0 + $0x18] sm:$0xff]  }
  0x17   :  { %v470_v12 = vrot.slane %v1502_v5, 3  ;;  %v242_v13 = vrot.slane %v1502_v5, 1  ;;  %v136_v14 = vshll.u32 %v1502_v5, 16  ;;  %vm281_vm4 = vsmask.f32 6400  ;;  %495 = vrot.lane.b32.xlu0 %v474_v11, %s1429_s18  ;;  %v1354_v56 = vld [vmem:[%s2018_s1 + $0x40] sm:$0xff]  }
  0x18   :  { %vm509_vm5 = vsmask.f32 4352  ;;  %v285_v15 = vshrl.u32 %v1502_v5, 16  ;;  %v396_v16 = vrot.slane %v129_v9, 2  ;;  %v397_v17 = vrot.slane %v131_v10, 3  ;;  %1236 = vmatprep.subr.bf16.mxu0 %v1354_v56  ;;  %v1355_v4 = vld [vmem:[%s2018_s1] sm:$0xff]  }
  0x19   :  { %v245_v18 = vrot.slane %v1490_v1, 1  ;;  %v471_v19 = vsel %vm468_vm1, %v469_v7, %v470_v12  ;;  %v243_v20 = vsel %vm240_vm2, %v241_v8, %v242_v13  ;;  %v400_v21 = vrot.slane %v136_v14, 3  ;;  %v1531_v50 = vld [vmem:[%s2017_s0 + $0x20] ss:$0 sps:$4 sm:$0xff]   ;;  %1237 = vmatpush3.bf16.msra.mxu0 %v1355_v4  ;;  %v1356_v12 = vld [vmem:[%s2018_s1 + $0x48] sm:$0xff]   ;;  %s1431_s30 = smov 96  }
  0x1a   :  { %v133_v22 = vrot.slane %v131_v10, 1  ;;  %493 = vrot.lane.b32.xlu1 %v471_v19, %s1429_s18  ;;  %v398_v23 = vor.u32 %v397_v17, %v396_v16  ;;  %v399_v24 = vrot.slane %v285_v15, 2  ;;  %v138_v25 = vrot.slane %v136_v14, 1  ;;  %v1357_v17 = vld [vmem:[%s2018_s1 + $0x8] sm:$0xff]   ;;  %1238 = vmatprep.subr.bf16.mxu0 %v1356_v12  ;;  %s1434_s22 = smov [#allocation5]  }
  0x1b   :  { %v282_v26 = vrot.slane %v129_v9, 1  ;;  %v283_v28 = vrot.slane %v131_v10, 2  ;;  %v287_v29 = vrot.slane %v285_v15, 1  ;;  %v288_v30 = vrot.slane %v136_v14, 2  ;;  %v1364_v4 = vld [vmem:[%s2018_s1 + $0x68] sm:$0xff]   ;;  %s1185_s23 = sshll.u32 %s1434_s22, 4  ;;  %s1186_s23 = int_to_ptr.vmem [resolvable:$true] %s1185_s23 }
  0x1c   :  { %v134_v27 = vor.u32 %v133_v22, %v129_v9  ;;  %v401_v31 = vor.u32 %v400_v21, %v399_v24  ;;  %v510_v32 = vrot.slane %v129_v9, 3  ;;  %v511_v33 = vrot.slane %v131_v10, 4  ;;  %v1358_v21 = vld [vmem:[%s2018_s1 + $0x50] sm:$0xff]   ;;  %s1400_s24 = scalar_lea.vmem %s1186_s23, 128  ;;  %p1405_p9 = scmp.lt.s32.totalorder %s1186_s23, %s1186_s23 }
  0x1d   :  { %v513_v34 = vrot.slane %v285_v15, 3  ;;  %v284_v35 = vor.u32 %v283_v28, %v282_v26  ;;  %v289_v36 = vor.u32 %v288_v30, %v287_v29  ;;  %v514_v37 = vrot.slane %v136_v14, 4  ;;  %1239 = vmatpush3.bf16.msra.mxu0 %v1357_v17  ;;  %v1359_v28 = vld [vmem:[%s2018_s1 + $0x10] sm:$0xff]   ;;  %p1401_p8 = scmp.ne.s32.totalorder %s1186_s23, %s1400_s24  ;;  %p1406_p10 = scmp.lt.s32.totalorder %s1400_s24, %s1400_s24 }
  0x1e   :  { %265 = vrot.lane.b32.xlu1 %v243_v20, %s1429_s18  ;;  %v402_v38 = vsel %vm395_vm0, %v398_v23, %v401_v31  ;;  %v512_v39 = vor.u32 %v511_v33, %v510_v32  ;;  %v141_v40 = vshrl.u32 %v1485_v0, 16  ;;  %v143_v41 = vshll.u32 %v1485_v0, 16  ;;  %v1588_v32 = vld [vmem:[%s2017_s0 + $0x2c] ss:$0 sps:$4 sm:$0xff]   ;;  %1240 = vmatprep.subr.bf16.mxu0 %v1358_v21  ;;  %v1360_v33 = vld [vmem:[%s2018_s1 + $0x58] sm:$0xff]  }
  0x1f   :  { %452 = vrot.lane.b32.xlu0 %v402_v38, %s1430_s19  ;;  %v246_v42 = vsel %vm240_vm2, %v244_v6, %v245_v18  ;;  %v515_v43 = vor.u32 %v514_v37, %v513_v34  ;;  %v148_v44 = vshll.u32 %v1490_v1, 16  ;;  %v294_v45 = vshrl.u32 %v1490_v1, 16  ;;  %v1601_v38 = vld [vmem:[%s2017_s0 + $0x24] sm:$0xff]   ;;  %p1407_p11 = por %p1406_p10, %p1405_p9 }
  0x20   :  { %v139_v46 = vsel %vm127_vm3, %v134_v27, %v138_v25  ;;  %v145_v47 = vrot.slane %v143_v41, 1  ;;  %v403_v48 = vrot.slane %v141_v40, 2  ;;  %v404_v49 = vrot.slane %v143_v41, 3 }
  0x21   :  { %v150_v51 = vrot.slane %v148_v44, 1  ;;  %v406_v52 = vrot.slane %v294_v45, 2  ;;  %v407_v53 = vrot.slane %v148_v44, 3  ;;  %v291_v54 = vrot.slane %v141_v40, 1  ;;  %1241 = vmatpush3.bf16.msra.mxu0 %v1359_v28  ;;  %p1408_p12 = pnand %p1407_p11, %p1401_p8 }
  0x22   :  { %267 = vrot.lane.b32.xlu1 %v246_v42, %s1429_s18  ;;  %v290_v57 = vsel %vm281_vm4, %v284_v35, %v289_v36  ;;  %v516_v58 = vsel %vm509_vm5, %v512_v39, %v515_v43  ;;  %v292_v59 = vrot.slane %v143_v41, 2  ;;  %v296_v60 = vrot.slane %v294_v45, 1  ;;  %1242 = vmatprep.subr.bf16.mxu0 %v1360_v33  ;;  %v1367_v33 = vld [vmem:[%s2018_s1 + $0x30] sm:$0xff]  }
  0x23   :  { %224 = vrot.lane.b32.xlu0 %v139_v46, %s1430_s19  ;;  %v146_v61 = vor.u32 %v145_v47, %v141_v40  ;;  %v297_v62 = vrot.slane %v148_v44, 2  ;;  %v517_v63 = vrot.slane %v141_v40, 3  ;;  %v518_v3 = vrot.slane %v143_v41, 4 }
  0x24   :  { %v405_v6 = vor.u32 %v404_v49, %v403_v48  ;;  %v408_v7 = vor.u32 %v407_v53, %v406_v52  ;;  %v520_v8 = vrot.slane %v294_v45, 3  ;;  %v521_v9 = vrot.slane %v148_v44, 4  ;;  %v1361_v44 = vld [vmem:[%s2018_s1 + $0x18] sm:$0xff]   ;;  %v1362_v49 = vld [vmem:[%s2018_s1 + $0x60] sm:$0xff]  }
  0x25   :  { %v293_v10 = vor.u32 %v292_v59, %v291_v54  ;;  %v1549_v11 = vshrl.u32 %v1536_v55, 16  ;;  %v298_v13 = vor.u32 %v297_v62, %v296_v60  ;;  %v1556_v14 = vshll.u32 %v1536_v55, 16  ;;  %1243 = vmatpush3.bf16.msra.mxu0 %v1361_v44 }
  0x26   :  { %354 = vrot.lane.b32.xlu1 %v290_v57, %s1431_s30  ;;  %v1559_v15 = vshll.u32 %v1531_v50, 16  ;;  %v1562_v16 = vshrl.u32 %v1531_v50, 16  ;;  %v151_v18 = vsel %vm127_vm3, %v146_v61, %v150_v51  ;;  %v519_v19 = vor.u32 %v518_v3, %v517_v63  ;;  %v1363_v61 = vld [vmem:[%s2018_s1 + $0x20] sm:$0xff]   ;;  %1244 = vmatprep.subr.bf16.mxu0 %v1362_v49 }
  0x27   :  { %566 = vrot.lane.b32.xlu0 %v516_v58, %s1431_s30  ;;  %v522_v20 = vor.u32 %v521_v9, %v520_v8  ;;  %v409_v22 = vsel %vm395_vm0, %v405_v6, %v408_v7  ;;  %v157_v23 = vrot.slane %v1556_v14, 1  ;;  %v410_v24 = vrot.slane %v1549_v11, 2 }
  0x28   :  { %v411_v25 = vrot.slane %v1556_v14, 3  ;;  %v413_v26 = vrot.slane %v1562_v16, 2  ;;  %v414_v27 = vrot.slane %v1559_v15, 3  ;;  %v299_v29 = vsel %vm281_vm4, %v293_v10, %v298_v13 }
  0x29   :  { %v158_v30 = vor.u32 %v157_v23, %v1549_v11  ;;  %v162_v31 = vrot.slane %v1559_v15, 1  ;;  %v523_v34 = vsel %vm509_vm5, %v519_v19, %v522_v20  ;;  %v247_v35 = vrot.slane %v1536_v55, 1  ;;  %1245 = vmatpush3.bf16.msra.mxu0 %v1363_v61  ;;  %v1366_v19 = vld [vmem:[%s2018_s1 + $0x70] sm:$0xff]  }
  0x2a   :  { %226 = vrot.lane.b32.xlu1 %v151_v18, %s1430_s19  ;;  %v248_v36 = vrot.slane %v1531_v50, 1  ;;  %v475_v37 = vrot.slane %v1536_v55, 3  ;;  %v412_v39 = vor.u32 %v411_v25, %v410_v24  ;;  %v415_v40 = vor.u32 %v414_v27, %v413_v26  ;;  %1246 = vmatprep.subr.bf16.mxu0 %v1364_v4  ;;  %v1673_v24 = vld [vmem:[%s2017_s0 + $0x38] ss:$0 sps:$4 sm:$0xff]  }
  0x2b   :  { %454 = vrot.lane.b32.xlu0 %v409_v22, %s1430_s19  ;;  %v476_v41 = vrot.slane %v1531_v50, 3  ;;  %v300_v42 = vrot.slane %v1549_v11, 1  ;;  %v301_v43 = vrot.slane %v1556_v14, 2  ;;  %v163_v45 = vsel %vm127_vm3, %v158_v30, %v162_v31 }
  0x2c   :  { %v305_v46 = vrot.slane %v1562_v16, 1  ;;  %v306_v47 = vrot.slane %v1559_v15, 2  ;;  %v524_v48 = vrot.slane %v1549_v11, 3  ;;  %v525_v51 = vrot.slane %v1556_v14, 4  ;;  %v1653_v14 = vld [vmem:[%s2017_s0 + $0x30] sm:$0xff]  }
  0x2d   :  { %v527_v52 = vrot.slane %v1562_v16, 3  ;;  %v528_v53 = vrot.slane %v1559_v15, 4  ;;  %v1622_v54 = vshll.u32 %v1601_v38, 16  ;;  %v416_v56 = vsel %vm395_vm0, %v412_v39, %v415_v40  ;;  %v1365_v16 = vld [vmem:[%s2018_s1 + $0x28] sm:$0xff]  }
  0x2e   :  { %356 = vrot.lane.b32.xlu1 %v299_v29, %s1431_s30  ;;  %v1626_v57 = vshrl.u32 %v1601_v38, 16  ;;  %v1629_v58 = vshll.u32 %v1588_v32, 16  ;;  %v1632_v59 = vshrl.u32 %v1588_v32, 16  ;;  %v249_v60 = vsel %vm240_vm2, %v247_v35, %v248_v36  ;;  %1247 = vmatpush3.bf16.msra.mxu0 %v1365_v16 }
  0x2f   :  { %568 = vrot.lane.b32.xlu0 %v523_v34, %s1431_s30  ;;  %v477_v62 = vsel %vm468_vm1, %v475_v37, %v476_v41  ;;  %v302_v63 = vor.u32 %v301_v43, %v300_v42  ;;  %v307_v3 = vor.u32 %v306_v47, %v305_v46  ;;  %v526_v6 = vor.u32 %v525_v51, %v524_v48  ;;  %v1368_v37 = vld [vmem:[%s2018_s1 + $0x78] sm:$0xff]  }
  0x30   :  { %v529_v7 = vor.u32 %v528_v53, %v527_v52  ;;  %v169_v8 = vrot.slane %v1622_v54, 1  ;;  %v250_v9 = vrot.slane %v1601_v38, 1  ;;  %v417_v10 = vrot.slane %v1626_v57, 2  ;;  %1248 = vmatprep.subr.bf16.mxu0 %v1366_v19 }
  0x31   :  { %v418_v11 = vrot.slane %v1622_v54, 3  ;;  %v420_v12 = vrot.slane %v1632_v59, 2  ;;  %v421_v13 = vrot.slane %v1629_v58, 3  ;;  %v174_v15 = vrot.slane %v1629_v58, 1 }
  0x32   :  { %228 = vrot.lane.b32.xlu1 %v163_v45, %s1430_s19  ;;  %v308_v17 = vsel %vm281_vm4, %v302_v63, %v307_v3  ;;  %v251_v18 = vrot.slane %v1588_v32, 1  ;;  %v530_v20 = vsel %vm509_vm5, %v526_v6, %v529_v7  ;;  %v170_v21 = vor.u32 %v169_v8, %v1626_v57  ;;  %1249 = vmatpush3.bf16.msra.mxu0 %v1367_v33  ;;  %v1369_v45 = vld [vmem:[%s2018_s1 + $0x38] sm:$0xff]   ;;  %v1718_v63 = vld [vmem:[%s2017_s0 + $0x44] ss:$0 sps:$4 sm:$0xff]  }
  0x33   :  { %456 = vrot.lane.b32.xlu0 %v416_v56, %s1430_s19  ;;  %v478_v22 = vrot.slane %v1601_v38, 3  ;;  %v479_v23 = vrot.slane %v1588_v32, 3  ;;  %v419_v25 = vor.u32 %v418_v11, %v417_v10  ;;  %v422_v26 = vor.u32 %v421_v13, %v420_v12  ;;  %1250 = vmatprep.subr.bf16.mxu0 %v1368_v37 }
  0x34   :  { %v309_v27 = vrot.slane %v1626_v57, 1  ;;  %v310_v28 = vrot.slane %v1622_v54, 2  ;;  %v314_v29 = vrot.slane %v1632_v59, 1  ;;  %v315_v30 = vrot.slane %v1629_v58, 2 }
  0x35   :  { %v531_v31 = vrot.slane %v1626_v57, 3  ;;  %v532_v34 = vrot.slane %v1622_v54, 4  ;;  %v534_v35 = vrot.slane %v1632_v59, 3  ;;  %v1687_v36 = vshll.u32 %v1653_v14, 16 }
  0x36   :  { %269 = vrot.lane.b32.xlu1 %v249_v60, %s1429_s18  ;;  %v175_v39 = vsel %vm127_vm3, %v170_v21, %v174_v15  ;;  %v535_v40 = vrot.slane %v1629_v58, 4  ;;  %v177_v41 = vshrl.u32 %v1653_v14, 16  ;;  %v423_v42 = vsel %vm395_vm0, %v419_v25, %v422_v26  ;;  %1251 = vmatpush3.bf16.msra.mxu0 %v1369_v45 }
  0x37   :  { %497 = vrot.lane.b32.xlu0 %v477_v62, %s1429_s18  ;;  %v184_v43 = vshll.u32 %v1673_v24, 16  ;;  %v321_v44 = vshrl.u32 %v1673_v24, 16  ;;  %v311_v46 = vor.u32 %v310_v28, %v309_v27  ;;  %v316_v47 = vor.u32 %v315_v30, %v314_v29  ;;  %v1713_v62 = vld [vmem:[%s2017_s0 + $0x3c] sm:$0xff]  }
  0x38   :  { %v181_v48 = vrot.slane %v1687_v36, 1  ;;  %v252_v49 = vsel %vm240_vm2, %v250_v9, %v251_v18  ;;  %v480_v51 = vsel %vm468_vm1, %v478_v22, %v479_v23  ;;  %v533_v52 = vor.u32 %v532_v34, %v531_v31 }
  0x39   :  { %v536_v53 = vor.u32 %v535_v40, %v534_v35  ;;  %v424_v54 = vrot.slane %v177_v41, 2  ;;  %v425_v56 = vrot.slane %v1687_v36, 3  ;;  %v427_v57 = vrot.slane %v321_v44, 2  ;;  %v1747_v40 = vld [vmem:[%s2017_s0 + $0x48] sm:$0xff]  }
  0x3a   :  { %358 = vrot.lane.b32.xlu1 %v308_v17, %s1431_s30  ;;  %v428_v58 = vrot.slane %v184_v43, 3  ;;  %v317_v59 = vsel %vm281_vm4, %v311_v46, %v316_v47  ;;  %v182_v60 = vor.u32 %v181_v48, %v177_v41  ;;  %v186_v61 = vrot.slane %v184_v43, 1 }
  0x3b   :  { %570 = vrot.lane.b32.xlu0 %v530_v20, %s1431_s30  ;;  %v537_v3 = vsel %vm509_vm5, %v533_v52, %v536_v53  ;;  %v253_v4 = vrot.slane %v1653_v14, 1  ;;  %v254_v6 = vrot.slane %v1673_v24, 1  ;;  %v481_v7 = vrot.slane %v1653_v14, 3 }
  0x3c   :  { %v426_v8 = vor.u32 %v425_v56, %v424_v54  ;;  %v429_v9 = vor.u32 %v428_v58, %v427_v57  ;;  %v482_v10 = vrot.slane %v1673_v24, 3  ;;  %v318_v11 = vrot.slane %v177_v41, 1 }
  0x3d   :  { %v319_v12 = vrot.slane %v1687_v36, 2  ;;  %v323_v13 = vrot.slane %v321_v44, 1  ;;  %v187_v15 = vsel %vm127_vm3, %v182_v60, %v186_v61  ;;  %v324_v16 = vrot.slane %v184_v43, 2 }
  0x3e   :  { %230 = vrot.lane.b32.xlu1 %v175_v39, %s1430_s19  ;;  %v1730_v17 = vshll.u32 %v1713_v62, 16  ;;  %v538_v18 = vrot.slane %v177_v41, 3  ;;  %v539_v19 = vrot.slane %v1687_v36, 4  ;;  %v541_v20 = vrot.slane %v321_v44, 3  ;;  %v1752_v41 = vld [vmem:[%s2017_s0 + $0x50] ss:$0 sps:$4 sm:$0xff]  }
  0x3f   :  { %458 = vrot.lane.b32.xlu0 %v423_v42, %s1430_s19  ;;  %v542_v21 = vrot.slane %v184_v43, 4  ;;  %v430_v22 = vsel %vm395_vm0, %v426_v8, %v429_v9  ;;  %v189_v23 = vshrl.u32 %v1713_v62, 16  ;;  %v196_v25 = vshll.u32 %v1718_v63, 16 }
  0x40   :  { %v330_v26 = vshrl.u32 %v1718_v63, 16  ;;  %v255_v27 = vsel %vm240_vm2, %v253_v4, %v254_v6  ;;  %v483_v28 = vsel %vm468_vm1, %v481_v7, %v482_v10  ;;  %v193_v29 = vrot.slane %v1730_v17, 1 }
  0x41   :  { %v320_v30 = vor.u32 %v319_v12, %v318_v11  ;;  %v325_v31 = vor.u32 %v324_v16, %v323_v13  ;;  %v540_v33 = vor.u32 %v539_v19, %v538_v18  ;;  %v543_v34 = vor.u32 %v542_v21, %v541_v20 }
  0x42   :  { %271 = vrot.lane.b32.xlu1 %v252_v49, %s1429_s18  ;;  %v431_v35 = vrot.slane %v189_v23, 2  ;;  %v432_v36 = vrot.slane %v1730_v17, 3  ;;  %v434_v37 = vrot.slane %v330_v26, 2  ;;  %v435_v39 = vrot.slane %v196_v25, 3 }
  0x43   :  { %499 = vrot.lane.b32.xlu0 %v480_v51, %s1429_s18  ;;  %v194_v42 = vor.u32 %v193_v29, %v189_v23  ;;  %v198_v43 = vrot.slane %v196_v25, 1  ;;  %v326_v44 = vsel %vm281_vm4, %v320_v30, %v325_v31  ;;  %v544_v45 = vsel %vm509_vm5, %v540_v33, %v543_v34 }
  0x44   :  { %v256_v46 = vrot.slane %v1713_v62, 1  ;;  %v433_v47 = vor.u32 %v432_v36, %v431_v35  ;;  %v436_v48 = vor.u32 %v435_v39, %v434_v37  ;;  %v257_v49 = vrot.slane %v1718_v63, 1 }
  0x45   :  { %v1761_v51 = vshll.u32 %v1747_v40, 16  ;;  %v327_v52 = vrot.slane %v189_v23, 1  ;;  %v1764_v53 = vshrl.u32 %v1747_v40, 16  ;;  %v1767_v54 = vshll.u32 %v1752_v41, 16 }
  0x46   :  { %360 = vrot.lane.b32.xlu1 %v317_v59, %s1431_s30  ;;  %v1770_v56 = vshrl.u32 %v1752_v41, 16  ;;  %v199_v57 = vsel %vm127_vm3, %v194_v42, %v198_v43  ;;  %v328_v58 = vrot.slane %v1730_v17, 2  ;;  %v332_v59 = vrot.slane %v330_v26, 1 }
  0x47   :  { %572 = vrot.lane.b32.xlu0 %v537_v3, %s1431_s30  ;;  %v333_v60 = vrot.slane %v196_v25, 2  ;;  %v545_v61 = vrot.slane %v189_v23, 3  ;;  %v546_v3 = vrot.slane %v1730_v17, 4  ;;  %v548_v4 = vrot.slane %v330_v26, 3 }
  0x48   :  { %v549_v6 = vrot.slane %v196_v25, 4  ;;  %v437_v7 = vsel %vm395_vm0, %v433_v47, %v436_v48  ;;  %v484_v8 = vrot.slane %v1713_v62, 3  ;;  %v485_v9 = vrot.slane %v1718_v63, 3 }
  0x49   :  { %v205_v10 = vrot.slane %v1761_v51, 1  ;;  %v438_v11 = vrot.slane %v1764_v53, 2  ;;  %v439_v12 = vrot.slane %v1761_v51, 3  ;;  %v441_v13 = vrot.slane %v1770_v56, 2 }
  0x4a   :  { %232 = vrot.lane.b32.xlu1 %v187_v15, %s1430_s19  ;;  %v442_v15 = vrot.slane %v1767_v54, 3  ;;  %v258_v16 = vsel %vm240_vm2, %v256_v46, %v257_v49  ;;  %v329_v17 = vor.u32 %v328_v58, %v327_v52  ;;  %v334_v18 = vor.u32 %v333_v60, %v332_v59 }
  0x4b   :  { %460 = vrot.lane.b32.xlu0 %v430_v22, %s1430_s19  ;;  %v547_v19 = vor.u32 %v546_v3, %v545_v61  ;;  %v550_v20 = vor.u32 %v549_v6, %v548_v4  ;;  %v486_v21 = vsel %vm468_vm1, %v484_v8, %v485_v9  ;;  %v206_v22 = vor.u32 %v205_v10, %v1764_v53 }
  0x4c   :  { %v210_v23 = vrot.slane %v1767_v54, 1  ;;  %v440_v25 = vor.u32 %v439_v12, %v438_v11  ;;  %v443_v26 = vor.u32 %v442_v15, %v441_v13  ;;  %vm370_vm6 = vcmask 1045504  }
  0x4d   :  { %v335_v29 = vsel %vm281_vm4, %v329_v17, %v334_v18  ;;  %v551_v30 = vsel %vm509_vm5, %v547_v19, %v550_v20  ;;  %v259_v31 = vrot.slane %v1747_v40, 1  ;;  %v260_v33 = vrot.slane %v1752_v41, 1 }
  0x4e   :  { %273 = vrot.lane.b32.xlu1 %v255_v27, %s1429_s18  ;;  %v1795_v27 = vld [vmem:[%s2017_s0 + $0x54] sm:$0xff]   ;;  %v211_v34 = vsel %vm127_vm3, %v206_v22, %v210_v23  ;;  %v487_v35 = vrot.slane %v1747_v40, 3  ;;  %v488_v36 = vrot.slane %v1752_v41, 3  ;;  %v336_v37 = vrot.slane %v1764_v53, 1 }
  0x4f   :  { %501 = vrot.lane.b32.xlu0 %v483_v28, %s1429_s18  ;;  %v1800_v28 = vld [vmem:[%s2017_s0 + $0x5c] ss:$0 sps:$4 sm:$0xff]   ;;  %v444_v39 = vsel %vm395_vm0, %v440_v25, %v443_v26  ;;  %v337_v42 = vrot.slane %v1761_v51, 2  ;;  %v341_v43 = vrot.slane %v1770_v56, 1  ;;  %v213_v46 = vshrl.u32 %v1795_v27, 16 }
  0x50   :  { %v215_v47 = vshll.u32 %v1795_v27, 16  ;;  %v220_v48 = vshll.u32 %v1800_v28, 16  ;;  %v348_v49 = vshrl.u32 %v1800_v28, 16  ;;  %v389_v52 = vrot.slane %v1747_v40, 2 }
  0x51   :  { %v392_v58 = vrot.slane %v1795_v27, 2  ;;  %v553_v59 = vrot.slane %v1761_v51, 4  ;;  %v556_v60 = vrot.slane %v1767_v54, 4  ;;  %v393_v61 = vrot.slane %v1800_v28, 2 }
  0x52   :  { %362 = vrot.lane.b32.xlu1 %v326_v44, %s1431_s30  ;;  %v342_v44 = vrot.slane %v1767_v54, 2  ;;  %v261_v3 = vsel %vm240_vm2, %v259_v31, %v260_v33  ;;  %v338_v6 = vor.u32 %v337_v42, %v336_v37  ;;  %v445_v51 = vrot.slane %v213_v46, 2 }
  0x53   :  { %574 = vrot.lane.b32.xlu0 %v544_v45, %s1431_s30  ;;  %v552_v45 = vrot.slane %v1764_v53, 3  ;;  %v555_v53 = vrot.slane %v1770_v56, 3  ;;  %v1835_v8 = vsel %vm370_vm6, %v392_v58, %v393_v61  ;;  %v446_v56 = vrot.slane %v215_v47, 3 }
  0x54   :  { %v448_v54 = vrot.slane %v348_v49, 2  ;;  %v449_v9 = vrot.slane %v220_v48, 3  ;;  %v489_v10 = vsel %vm468_vm1, %v487_v35, %v488_v36  ;;  %v262_v20 = vrot.slane %v1795_v27, 1 }
  0x55   :  { %v554_v11 = vor.u32 %v553_v59, %v552_v45  ;;  %v557_v12 = vor.u32 %v556_v60, %v555_v53  ;;  %v447_v17 = vor.u32 %v446_v56, %v445_v51  ;;  %v490_v22 = vrot.slane %v1795_v27, 3 }
  0x56   :  { %234 = vrot.lane.b32.xlu1 %v199_v57, %s1430_s19  ;;  %v390_v57 = vrot.slane %v1752_v41, 2  ;;  %v217_v41 = vrot.slane %v215_v47, 1  ;;  %v450_v18 = vor.u32 %v449_v9, %v448_v54  ;;  %v491_v23 = vrot.slane %v1800_v28, 3 }
  0x57   :  { %462 = vrot.lane.b32.xlu0 %v437_v7, %s1430_s19  ;;  %v343_v7 = vor.u32 %v342_v44, %v341_v43  ;;  %v558_v19 = vsel %vm509_vm5, %v554_v11, %v557_v12  ;;  %v345_v25 = vrot.slane %v213_v46, 1  ;;  %v346_v26 = vrot.slane %v215_v47, 2 }
  0x58   :  { %v1831_v4 = vsel %vm370_vm6, %v389_v52, %v390_v57  ;;  %v218_v15 = vor.u32 %v217_v41, %v213_v46  ;;  %v350_v31 = vrot.slane %v348_v49, 1  ;;  %v351_v33 = vrot.slane %v220_v48, 2 }
  0x59   :  { %v344_v13 = vsel %vm281_vm4, %v338_v6, %v343_v7  ;;  %v560_v35 = vrot.slane %v215_v47, 4  ;;  %v562_v36 = vrot.slane %v348_v49, 3  ;;  %v563_v37 = vrot.slane %v220_v48, 4 }
  0x5a   :  { %275 = vrot.lane.b32.xlu1 %v258_v16, %s1429_s18  ;;  %v222_v16 = vrot.slane %v220_v48, 1  ;;  %v352_v42 = vor.u32 %v351_v33, %v350_v31  ;;  %v492_v43 = vsel %vm468_vm1, %v490_v22, %v491_v23  ;;  %v371_v52 = vrot.slane %v1495_v2, 2 }
  0x5b   :  { %503 = vrot.lane.b32.xlu0 %v486_v21, %s1429_s18  ;;  %v263_v21 = vrot.slane %v1800_v28, 1  ;;  %v564_v45 = vor.u32 %v563_v37, %v562_v36  ;;  %v372_v57 = vrot.slane %v1502_v5, 2  ;;  %vm582_vm7 = vcmask 261120  }
  0x5c   :  { %vm599_vm8 = vcmask 523264   ;;  %vm616_vm9 = vcmask 785408   ;;  %v374_v7 = vrot.slane %v1485_v0, 2  ;;  %v375_v41 = vrot.slane %v1490_v1, 2 }
  0x5d   :  { %v264_v28 = vsel %vm240_vm2, %v262_v20, %v263_v21  ;;  %v373_v53 = vsel %vm370_vm6, %v371_v52, %v372_v57  ;;  %v377_v22 = vrot.slane %v1536_v55, 2  ;;  %vm1433_vm10 = vmmov 0  }
  0x5e   :  { %364 = vrot.lane.b32.xlu1 %v335_v29, %s1431_s30  ;;  %v223_v29 = vsel %vm127_vm3, %v218_v15, %v222_v16  ;;  %v376_v11 = vsel %vm370_vm6, %v374_v7, %v375_v41  ;;  %vm1074_vm11 = vcmask 1041409   ;;  %vm1076_vm12 = vcmask 1042434  }
  0x5f   :  { %576 = vrot.lane.b32.xlu0 %v551_v30, %s1431_s30  ;;  %v451_v30 = vsel %vm395_vm0, %v447_v17, %v450_v18  ;;  %vm1078_vm13 = vcmask 1043459   ;;  %vm1080_vm14 = vcmask 1044484   ;;  %vm1082_vm15 = vcmask 1045509  }
  0x60   :  { %vm1084_vm0 = vcmask 1046534   ;;  %vm1086_vm1 = vcmask 1047559  }
  0x62   :  { %236 = vrot.lane.b32.xlu1 %v211_v34, %s1430_s19  ;;  %v559_v34 = vrot.slane %v213_v46, 3 }
  0x63   :  { %464 = vrot.lane.b32.xlu0 %v444_v39, %s1430_s19  ;;  %v347_v39 = vor.u32 %v346_v26, %v345_v25 }
  0x64   :  { %v561_v44 = vor.u32 %v560_v35, %v559_v34 }
  0x65   :  { %v353_v46 = vsel %vm281_vm4, %v347_v39, %v352_v42  ;;  %v380_v39 = vrot.slane %v1601_v38, 2  ;;  %v381_v42 = vrot.slane %v1588_v32, 2 }
  0x66   :  { %277 = vrot.lane.b32.xlu1 %v261_v3, %s1429_s18  ;;  %v565_v47 = vsel %vm509_vm5, %v561_v44, %v564_v45 }
  0x67   :  { %505 = vrot.lane.b32.xlu0 %v489_v10, %s1429_s18  ;;  %v382_v44 = vsel %vm370_vm6, %v380_v39, %v381_v42 }
  0x6a   :  { %366 = vrot.lane.b32.xlu1 %v344_v13, %s1431_s30 }
  0x6b   :  { %578 = vrot.lane.b32.xlu0 %v558_v19, %s1431_s30 }
  0x6e   :  { %238 = vrot.lane.b32.xlu1 %v223_v29, %s1430_s19 }
  0x6f   :  { %466 = vrot.lane.b32.xlu0 %v451_v30, %s1430_s19 }
  0x72   :  { %279 = vrot.lane.b32.xlu1 %v264_v28, %s1429_s18 }
  0x73   :  { %507 = vrot.lane.b32.xlu0 %v492_v43, %s1429_s18 }
  0x76   :  { %368 = vrot.lane.b32.xlu1 %v353_v46, %s1431_s30 }
  0x77   :  { %580 = vrot.lane.b32.xlu0 %v565_v47, %s1431_s30 }
  0x89   :  { %v496_v48 = vpop.permute.xlu0 %495 }
  0x8c   :  { %v494_v49 = vpop.permute.xlu1 %493 }
  0x90   :  { %v266_v58 = vpop.permute.xlu1 %265 }
  0x91   :  { %v453_v59 = vpop.permute.xlu0 %452 }
  0x92   :  { %v643_v3 = vsel %vm582_vm7, %v373_v53, %v453_v59  ;;  %v383_v53 = vrot.slane %v1653_v14, 2 }
  0x93   :  { %v666_v54 = vsel %vm599_vm8, %v643_v3, %v494_v49 }
  0x94   :  { %v268_v60 = vpop.permute.xlu1 %267 }
  0x95   :  { %v225_v61 = vpop.permute.xlu0 %224 }
  0x96   :  { %v584_v6 = vsel %vm582_vm7, %v1495_v2, %v225_v61 }
  0x97   :  { %v601_v5 = vsel %vm599_vm8, %v584_v6, %v266_v58 }
  0x98   :  { %v355_v51 = vpop.permute.xlu1 %354 }
  0x99   :  { %v567_v56 = vpop.permute.xlu0 %566  ;;  %v618_v9 = vsel %vm616_vm9, %v601_v5, %v355_v51 }
  0x9a   :  { %v682_v10 = vsel %vm616_vm9, %v666_v54, %v567_v56 }
  0x9b   :  { %872 = vmatprep.mubr.bf16.mxu0 %v682_v10 }
  0x9c   :  { %873 = vmatmul.mubr.bf16.vlgmr.msra.gmra.mrb[0].mxu0 %v618_v9  ;;  %v227_v2 = vpop.permute.xlu1 %226 }
  0x9d   :  { %v586_v12 = vsel %vm582_vm7, %v1485_v0, %v227_v2  ;;  %v455_v13 = vpop.permute.xlu0 %454  ;;  %v378_v0 = vrot.slane %v1531_v50, 2  ;;  %v387_v2 = vrot.slane %v1718_v63, 2 }
  0x9e   :  { %v646_v1 = vsel %vm582_vm7, %v376_v11, %v455_v13  ;;  %v603_v16 = vsel %vm599_vm8, %v586_v12, %v268_v60  ;;  %v384_v60 = vrot.slane %v1673_v24, 2  ;;  %v386_v11 = vrot.slane %v1713_v62, 2 }
  0x9f   :  { %v668_v18 = vsel %vm599_vm8, %v646_v1, %v496_v48  ;;  %v379_v26 = vsel %vm370_vm6, %v377_v22, %v378_v0 }
  0xa0   :  { %v357_v15 = vpop.permute.xlu1 %356  ;;  %v385_v3 = vsel %vm370_vm6, %v383_v53, %v384_v60  ;;  %v388_v13 = vsel %vm370_vm6, %v386_v11, %v387_v2 }
  0xa1   :  { %v569_v17 = vpop.permute.xlu0 %568  ;;  %v621_v19 = vsel %vm616_vm9, %v603_v16, %v357_v15 }
  0xa2   :  { %v685_v20 = vsel %vm616_vm9, %v668_v18, %v569_v17 }
  0xa3   :  { %880 = vmatprep.mubr.bf16.mxu0 %v685_v20 }
  0xa4   :  { %881 = vmatmul.mubr.bf16.gmra.mrb[4].mxu0 %v621_v19  ;;  %v229_v21 = vpop.permute.xlu1 %228 }
  0xa5   :  { %v457_v23 = vpop.permute.xlu0 %456  ;;  %v588_v30 = vsel %vm582_vm7, %v1536_v55, %v229_v21 }
  0xa6   :  { %v649_v31 = vsel %vm582_vm7, %v379_v26, %v457_v23 }
  0xa8   :  { %v270_v25 = vpop.permute.xlu1 %269 }
  0xa9   :  { %v498_v29 = vpop.permute.xlu0 %497  ;;  %v605_v33 = vsel %vm599_vm8, %v588_v30, %v270_v25 }
  0xaa   :  { %v670_v35 = vsel %vm599_vm8, %v649_v31, %v498_v29 }
  0xac   :  { %v359_v34 = vpop.permute.xlu1 %358 }
  0xad   :  { %v571_v36 = vpop.permute.xlu0 %570  ;;  %v624_v37 = vsel %vm616_vm9, %v605_v33, %v359_v34 }
  0xae   :  { %v688_v50 = vsel %vm616_vm9, %v670_v35, %v571_v36 }
  0xaf   :  { %888 = vmatprep.mubr.bf16.mxu0 %v688_v50 }
  0xb0   :  { %889 = vmatmul.mubr.bf16.gmra.mrb[8].mxu0 %v624_v37  ;;  %v231_v28 = vpop.permute.xlu1 %230 }
  0xb1   :  { %v459_v55 = vpop.permute.xlu0 %458  ;;  %v590_v46 = vsel %vm582_vm7, %v1601_v38, %v231_v28 }
  0xb2   :  { %v652_v47 = vsel %vm582_vm7, %v382_v44, %v459_v55 }
  0xb4   :  { %v272_v43 = vpop.permute.xlu1 %271 }
  0xb5   :  { %v500_v45 = vpop.permute.xlu0 %499  ;;  %v607_v48 = vsel %vm599_vm8, %v590_v46, %v272_v43  ;;  %v1370_v46 = vld [vmem:[%s2021_s4] sm:$0xff]  }
  0xb6   :  { %v672_v52 = vsel %vm599_vm8, %v652_v47, %v500_v45  ;;  %v1372_v47 = vld [vmem:[%s2021_s4 + $0x10] sm:$0xff]  }
  0xb8   :  { %v361_v49 = vpop.permute.xlu1 %360 }
  0xb9   :  { %v573_v57 = vpop.permute.xlu0 %572  ;;  %v627_v58 = vsel %vm616_vm9, %v607_v48, %v361_v49  ;;  %v1373_v48 = vld [vmem:[%s2021_s4 + $0x18] sm:$0xff]   ;;  %v1374_v49 = vld [vmem:[%s2021_s4 + $0x20] sm:$0xff]  }
  0xba   :  { %v691_v32 = vsel %vm616_vm9, %v672_v52, %v573_v57  ;;  %v1375_v52 = vld [vmem:[%s2021_s4 + $0x28] sm:$0xff]   ;;  %v1376_v57 = vld [vmem:[%s2021_s4 + $0x30] sm:$0xff]  }
  0xbb   :  { %896 = vmatprep.mubr.bf16.mxu0 %v691_v32 }
  0xbc   :  { %897 = vmatmul.mubr.bf16.gmra.mrb[12].mxu0 %v627_v58  ;;  %v233_v59 = vpop.permute.xlu1 %232  ;;  %v1377_v58 = vld [vmem:[%s2021_s4 + $0x38] sm:$0xff]  }
  0xbd   :  { %v461_v38 = vpop.permute.xlu0 %460  ;;  %v592_v7 = vsel %vm582_vm7, %v1653_v14, %v233_v59  ;;  %v1964_v59 = vld [vmem:[%s2019_s2] ss:$0 sm:$0xff] }
  0xbe   :  { %v655_v41 = vsel %vm582_vm7, %v385_v3, %v461_v38 }
  0xc0   :  { %v274_v61 = vpop.permute.xlu1 %273 }
  0xc1   :  { %v502_v6 = vpop.permute.xlu0 %501  ;;  %v609_v51 = vsel %vm599_vm8, %v592_v7, %v274_v61 }
  0xc2   :  { %v674_v56 = vsel %vm599_vm8, %v655_v41, %v502_v6 }
  0xc4   :  { %v363_v5 = vpop.permute.xlu1 %362 }
  0xc5   :  { %v575_v54 = vpop.permute.xlu0 %574  ;;  %v630_v9 = vsel %vm616_vm9, %v609_v51, %v363_v5  ;;  %v1968_v51 = vld [vmem:[#allocation2] sm:$0xff]  ;;  %v1970_v5 = vld [vmem:[#allocation2 + $0x8] sm:$0xff] }
  0xc6   :  { %v694_v24 = vsel %vm616_vm9, %v674_v56, %v575_v54 }
  0xc7   :  { %904 = vmatprep.mubr.bf16.mxu0 %v694_v24 }
  0xc8   :  { %905 = vmatmul.mubr.bf16.gmra.mrb[16].mxu0 %v630_v9  ;;  %v235_v10 = vpop.permute.xlu1 %234 }
  0xc9   :  { %v463_v14 = vpop.permute.xlu0 %462  ;;  %v594_v15 = vsel %vm582_vm7, %v1713_v62, %v235_v10 }
  0xca   :  { %v658_v16 = vsel %vm582_vm7, %v388_v13, %v463_v14 }
  0xcc   :  { %v276_v12 = vpop.permute.xlu1 %275 }
  0xcd   :  { %v504_v1 = vpop.permute.xlu0 %503  ;;  %v611_v17 = vsel %vm599_vm8, %v594_v15, %v276_v12 }
  0xce   :  { %v676_v19 = vsel %vm599_vm8, %v658_v16, %v504_v1 }
  0xd0   :  { %v365_v18 = vpop.permute.xlu1 %364 }
  0xd1   :  { %v577_v20 = vpop.permute.xlu0 %576  ;;  %v633_v21 = vsel %vm616_vm9, %v611_v17, %v365_v18 }
  0xd2   :  { %v697_v63 = vsel %vm616_vm9, %v676_v19, %v577_v20 }
  0xd3   :  { %912 = vmatprep.mubr.bf16.mxu0 %v697_v63 }
  0xd4   :  { %913 = vmatmul.mubr.bf16.gmra.mrb[20].mxu0 %v633_v21  ;;  %v237_v22 = vpop.permute.xlu1 %236 }
  0xd5   :  { %v465_v0 = vpop.permute.xlu0 %464  ;;  %v596_v62 = vsel %vm582_vm7, %v1747_v40, %v237_v22 }
  0xd6   :  { %v661_v26 = vsel %vm582_vm7, %v1831_v4, %v465_v0 }
  0xd8   :  { %v278_v23 = vpop.permute.xlu1 %277 }
  0xd9   :  { %v506_v25 = vpop.permute.xlu0 %505  ;;  %v613_v29 = vsel %vm599_vm8, %v596_v62, %v278_v23 }
  0xda   :  { %v678_v31 = vsel %vm599_vm8, %v661_v26, %v506_v25 }
  0xdc   :  { %v367_v30 = vpop.permute.xlu1 %366 }
  0xdd   :  { %v579_v33 = vpop.permute.xlu0 %578  ;;  %v636_v34 = vsel %vm616_vm9, %v613_v29, %v367_v30 }
  0xde   :  { %v700_v35 = vsel %vm616_vm9, %v678_v31, %v579_v33 }
  0xdf   :  { %920 = vmatprep.mubr.bf16.mxu0 %v700_v35 }
  0xe0   :  { %921 = vmatmul.mubr.bf16.gmra.mrb[24].mxu0 %v636_v34  ;;  %v239_v36 = vpop.permute.xlu1 %238 }
  0xe1   :  { %v467_v37 = vpop.permute.xlu0 %466  ;;  %v598_v40 = vsel %vm582_vm7, %v1795_v27, %v239_v36  ;;  %v1432_v27 = vmov 0.0  }
  0xe2   :  { %v664_v4 = vsel %vm582_vm7, %v1835_v8, %v467_v37  ;;  %1309 = vmatprep.subr.bf16.mxu1 %v1432_v27  ;;  %v1371_v8 = vld [vmem:[%s2021_s4 + $0x8] sm:$0xff]   ;;  %1325 = vmatprep.mubr.msk.bf16.mxu1 %vm1433_vm10, %v1432_v27 }
  0xe3   :  { %1310 = vmatpush3.bf16.msra.mxu1 %v1370_v46 }
  0xe4   :  { %v280_v50 = vpop.permute.xlu1 %279  ;;  %1311 = vmatprep.subr.bf16.mxu1 %v1432_v27 }
  0xe5   :  { %v508_v28 = vpop.permute.xlu0 %507  ;;  %v615_v39 = vsel %vm599_vm8, %v598_v40, %v280_v50 }
  0xe6   :  { %v680_v55 = vsel %vm599_vm8, %v664_v4, %v508_v28 }
  0xe7   :  { %1312 = vmatpush3.bf16.msra.mxu1 %v1371_v8 }
  0xe8   :  { %v369_v42 = vpop.permute.xlu1 %368  ;;  %1313 = vmatprep.subr.bf16.mxu1 %v1432_v27 }
  0xe9   :  { %v581_v43 = vpop.permute.xlu0 %580  ;;  %v639_v44 = vsel %vm616_vm9, %v615_v39, %v369_v42 }
  0xea   :  { %v703_v45 = vsel %vm616_vm9, %v680_v55, %v581_v43 }
  0xeb   :  { %928 = vmatprep.mubr.bf16.mxu0 %v703_v45  ;;  %1314 = vmatpush3.bf16.msra.mxu1 %v1372_v47 }
  0xec   :  { %929 = vmatmul.mubr.bf16.gmra.mrb[28].mxu0 %v639_v44  ;;  %1315 = vmatprep.subr.bf16.mxu1 %v1432_v27 }
  0xef   :  { %1316 = vmatpush3.bf16.msra.mxu1 %v1373_v48 }
  0xf0   :  { %1317 = vmatprep.subr.bf16.mxu1 %v1432_v27 }
  0xf3   :  { %1318 = vmatpush3.bf16.msra.mxu1 %v1374_v49 }
  0xf4   :  { %1319 = vmatprep.subr.bf16.mxu1 %v1432_v27 }
  0xf7   :  { %1320 = vmatpush3.bf16.msra.mxu1 %v1375_v52 }
  0xf8   :  { %1321 = vmatprep.subr.bf16.mxu1 %v1432_v27 }
  0xfb   :  { %1322 = vmatpush3.bf16.msra.mxu1 %v1376_v57 }
  0xfc   :  { %1323 = vmatprep.subr.bf16.mxu1 %v1432_v27 }
  0xff   :  { %1324 = vmatpush3.bf16.msra.mxu1 %v1377_v58 }
 0x16f   :  { %v1252_v32 = vpop.f32.mrb[0].mxu0 }
 0x170   :  { %v1253_v53 = vpop.f32.mrb[1].mxu0 }
 0x171   :  { %v1254_v60 = vadd.f32 %v1253_v53, %v1252_v32  ;;  %v1255_v38 = vpop.f32.mrb[2].mxu0 }
 0x172   :  { %v1256_v61 = vpop.f32.mrb[3].mxu0 }
 0x173   :  { %v875_v3 = vadd.f32 %v1254_v60, %v1964_v59  ;;  %v1257_v6 = vadd.f32 %v1256_v61, %v1255_v38 }
 0x175   :  { %v937_v7 = vmax.f32 %v875_v3, 0.0  ;;  %v878_v41 = vadd.f32 %v1257_v6, %v1964_v59 }
 0x177   :  { %v938_v56 = vmax.f32 %v878_v41, 0.0  ;;  %v1258_v54 = vpop.f32.mrb[4].mxu0  ;;  %v955_v24 = vmul.f32 %v1968_v51, %v937_v7 }
 0x178   :  { %v1259_v9 = vpop.f32.mrb[5].mxu0 }
 0x179   :  { %v956_v10 = vmul.f32 %v1970_v5, %v938_v56  ;;  %v1260_v11 = vadd.f32 %v1259_v9, %v1258_v54  ;;  %v1261_v2 = vpop.f32.mrb[6].mxu0 }
 0x17a   :  { %v1262_v14 = vpop.f32.mrb[7].mxu0 }
 0x17b   :  { %v971_v12 = vmax.f32 %v955_v24, %v956_v10  ;;  %v883_v13 = vadd.f32 %v1260_v11, %v1964_v59  ;;  %v1263_v1 = vadd.f32 %v1262_v14, %v1261_v2 }
 0x17d   :  { %v972_v15 = vrot.slane %v971_v12, 4  ;;  %v939_v16 = vmax.f32 %v883_v13, 0.0  ;;  %v886_v17 = vadd.f32 %v1263_v1, %v1964_v59 }
 0x17f   :  { %v973_v18 = vmax.f32 %v971_v12, %v972_v15  ;;  %v940_v19 = vmax.f32 %v886_v17, 0.0  ;;  %v957_v21 = vmul.f32 %v1968_v51, %v939_v16 }
 0x181   :  { %v974_v20 = vrot.slane %v973_v18, 2  ;;  %v958_v63 = vmul.f32 %v1970_v5, %v940_v19 }
 0x183   :  { %v975_v22 = vmax.f32 %v973_v18, %v974_v20  ;;  %v978_v0 = vmax.f32 %v957_v21, %v958_v63  ;;  %v1264_v23 = vpop.f32.mrb[8].mxu0 }
 0x184   :  { %v1265_v25 = vpop.f32.mrb[9].mxu0 }
 0x185   :  { %v979_v62 = vrot.slane %v978_v0, 4  ;;  %v1266_v26 = vadd.f32 %v1265_v25, %v1264_v23  ;;  %v1267_v29 = vpop.f32.mrb[10].mxu0  ;;  %v976_v30 = vrot.slane %v975_v22, 1 }
 0x186   :  { %v1268_v31 = vpop.f32.mrb[11].mxu0 }
 0x187   :  { %v980_v33 = vmax.f32 %v978_v0, %v979_v62  ;;  %v891_v34 = vadd.f32 %v1266_v26, %v1964_v59  ;;  %v1269_v35 = vadd.f32 %v1268_v31, %v1267_v29  ;;  %v977_v28 = vmax.f32 %v975_v22, %v976_v30 }
 0x189   :  { %v981_v36 = vrot.slane %v980_v33, 2  ;;  %v941_v37 = vmax.f32 %v891_v34, 0.0  ;;  %v894_v50 = vadd.f32 %v1269_v35, %v1964_v59  ;;  %v1027_v43 = vpack.c.bf16 %v977_v28, %v977_v28 }
 0x18b   :  { %v982_v40 = vmax.f32 %v980_v33, %v981_v36  ;;  %v942_v4 = vmax.f32 %v894_v50, 0.0  ;;  %v959_v42 = vmul.f32 %v1968_v51, %v941_v37  ;;  %v1066_v52 = vunpack.c.l.b16 %v1027_v43 }
 0x18d   :  { %v983_v39 = vrot.slane %v982_v40, 1  ;;  %v960_v55 = vmul.f32 %v1970_v5, %v942_v4 }
 0x18f   :  { %v984_v44 = vmax.f32 %v982_v40, %v983_v39  ;;  %v985_v45 = vmax.f32 %v959_v42, %v960_v55  ;;  %v1270_v46 = vpop.f32.mrb[12].mxu0 }
 0x190   :  { %v1271_v27 = vpop.f32.mrb[13].mxu0 }
 0x191   :  { %v1028_v8 = vpack.c.bf16 %v984_v44, %v984_v44  ;;  %v986_v47 = vrot.slane %v985_v45, 4  ;;  %v1272_v48 = vadd.f32 %v1271_v27, %v1270_v46  ;;  %v1273_v49 = vpop.f32.mrb[14].mxu0 }
 0x192   :  { %v1274_v57 = vpop.f32.mrb[15].mxu0 }
 0x193   :  { %v1067_v58 = vunpack.c.l.b16 %v1028_v8  ;;  %v987_v32 = vmax.f32 %v985_v45, %v986_v47  ;;  %v899_v53 = vadd.f32 %v1272_v48, %v1964_v59  ;;  %v1275_v60 = vadd.f32 %v1274_v57, %v1273_v49 }
 0x195   :  { %v988_v38 = vrot.slane %v987_v32, 2  ;;  %v943_v61 = vmax.f32 %v899_v53, 0.0  ;;  %v902_v3 = vadd.f32 %v1275_v60, %v1964_v59  ;;  %v1075_v6 = vsel %vm1074_vm11, %v1067_v58, %v1066_v52 }
 0x197   :  { %v989_v7 = vmax.f32 %v987_v32, %v988_v38  ;;  %v944_v41 = vmax.f32 %v902_v3, 0.0  ;;  %v961_v54 = vmul.f32 %v1968_v51, %v943_v61 }
 0x199   :  { %v990_v56 = vrot.slane %v989_v7, 1  ;;  %v962_v9 = vmul.f32 %v1970_v5, %v944_v41 }
 0x19b   :  { %v991_v24 = vmax.f32 %v989_v7, %v990_v56  ;;  %v992_v10 = vmax.f32 %v961_v54, %v962_v9  ;;  %v1276_v11 = vpop.f32.mrb[16].mxu0 }
 0x19c   :  { %v1277_v2 = vpop.f32.mrb[17].mxu0 }
 0x19d   :  { %v1029_v14 = vpack.c.bf16 %v991_v24, %v991_v24  ;;  %v993_v12 = vrot.slane %v992_v10, 4  ;;  %v1278_v13 = vadd.f32 %v1277_v2, %v1276_v11  ;;  %v1279_v1 = vpop.f32.mrb[18].mxu0 }
 0x19e   :  { %v1280_v15 = vpop.f32.mrb[19].mxu0 }
 0x19f   :  { %v1068_v16 = vunpack.c.l.b16 %v1029_v14  ;;  %v994_v17 = vmax.f32 %v992_v10, %v993_v12  ;;  %v907_v18 = vadd.f32 %v1278_v13, %v1964_v59  ;;  %v1281_v19 = vadd.f32 %v1280_v15, %v1279_v1 }
 0x1a1   :  { %v995_v20 = vrot.slane %v994_v17, 2  ;;  %v945_v21 = vmax.f32 %v907_v18, 0.0  ;;  %v910_v63 = vadd.f32 %v1281_v19, %v1964_v59  ;;  %v1077_v22 = vsel %vm1076_vm12, %v1068_v16, %v1075_v6 }
 0x1a3   :  { %v996_v0 = vmax.f32 %v994_v17, %v995_v20  ;;  %v946_v23 = vmax.f32 %v910_v63, 0.0  ;;  %v963_v62 = vmul.f32 %v1968_v51, %v945_v21 }
 0x1a5   :  { %v997_v25 = vrot.slane %v996_v0, 1  ;;  %v964_v26 = vmul.f32 %v1970_v5, %v946_v23 }
 0x1a7   :  { %v998_v29 = vmax.f32 %v996_v0, %v997_v25  ;;  %v999_v30 = vmax.f32 %v963_v62, %v964_v26  ;;  %v1282_v31 = vpop.f32.mrb[20].mxu0 }
 0x1a8   :  { %v1283_v33 = vpop.f32.mrb[21].mxu0 }
 0x1a9   :  { %v1030_v34 = vpack.c.bf16 %v998_v29, %v998_v29  ;;  %v1000_v35 = vrot.slane %v999_v30, 4  ;;  %v1284_v36 = vadd.f32 %v1283_v33, %v1282_v31  ;;  %v1285_v37 = vpop.f32.mrb[22].mxu0 }
 0x1aa   :  { %v1286_v50 = vpop.f32.mrb[23].mxu0 }
 0x1ab   :  { %v1069_v28 = vunpack.c.l.b16 %v1030_v34  ;;  %v1001_v40 = vmax.f32 %v999_v30, %v1000_v35  ;;  %v915_v4 = vadd.f32 %v1284_v36, %v1964_v59  ;;  %v1287_v39 = vadd.f32 %v1286_v50, %v1285_v37 }
 0x1ad   :  { %v1002_v42 = vrot.slane %v1001_v40, 2  ;;  %v947_v55 = vmax.f32 %v915_v4, 0.0  ;;  %v918_v43 = vadd.f32 %v1287_v39, %v1964_v59  ;;  %v1079_v44 = vsel %vm1078_vm13, %v1069_v28, %v1077_v22 }
 0x1af   :  { %v1003_v45 = vmax.f32 %v1001_v40, %v1002_v42  ;;  %v948_v46 = vmax.f32 %v918_v43, 0.0  ;;  %v965_v8 = vmul.f32 %v1968_v51, %v947_v55 }
 0x1b1   :  { %v1004_v27 = vrot.slane %v1003_v45, 1  ;;  %v966_v47 = vmul.f32 %v1970_v5, %v948_v46 }
 0x1b3   :  { %v1005_v48 = vmax.f32 %v1003_v45, %v1004_v27  ;;  %v1006_v49 = vmax.f32 %v965_v8, %v966_v47  ;;  %v1288_v52 = vpop.f32.mrb[24].mxu0 }
 0x1b4   :  { %v1289_v57 = vpop.f32.mrb[25].mxu0 }
 0x1b5   :  { %v1031_v58 = vpack.c.bf16 %v1005_v48, %v1005_v48  ;;  %v1007_v32 = vrot.slane %v1006_v49, 4  ;;  %v1290_v53 = vadd.f32 %v1289_v57, %v1288_v52  ;;  %v1291_v60 = vpop.f32.mrb[26].mxu0 }
 0x1b6   :  { %v1292_v38 = vpop.f32.mrb[27].mxu0 }
 0x1b7   :  { %v1070_v61 = vunpack.c.l.b16 %v1031_v58  ;;  %v1008_v3 = vmax.f32 %v1006_v49, %v1007_v32  ;;  %v923_v6 = vadd.f32 %v1290_v53, %v1964_v59  ;;  %v1293_v7 = vadd.f32 %v1292_v38, %v1291_v60 }
 0x1b9   :  { %v1009_v41 = vrot.slane %v1008_v3, 2  ;;  %v949_v56 = vmax.f32 %v923_v6, 0.0  ;;  %v926_v54 = vadd.f32 %v1293_v7, %v1964_v59  ;;  %v1081_v9 = vsel %vm1080_vm14, %v1070_v61, %v1079_v44 }
 0x1bb   :  { %v1010_v24 = vmax.f32 %v1008_v3, %v1009_v41  ;;  %v950_v10 = vmax.f32 %v926_v54, 0.0  ;;  %v967_v2 = vmul.f32 %v1968_v51, %v949_v56 }
 0x1bd   :  { %v1011_v11 = vrot.slane %v1010_v24, 1  ;;  %v968_v14 = vmul.f32 %v1970_v5, %v950_v10 }
 0x1bf   :  { %v1012_v12 = vmax.f32 %v1010_v24, %v1011_v11  ;;  %v1013_v13 = vmax.f32 %v967_v2, %v968_v14  ;;  %v1294_v1 = vpop.f32.mrb[28].mxu0 }
 0x1c0   :  { %v1295_v15 = vpop.f32.mrb[29].mxu0 }
 0x1c1   :  { %v1032_v16 = vpack.c.bf16 %v1012_v12, %v1012_v12  ;;  %v1014_v17 = vrot.slane %v1013_v13, 4  ;;  %v1296_v18 = vadd.f32 %v1295_v15, %v1294_v1  ;;  %v1297_v19 = vpop.f32.mrb[30].mxu0 }
 0x1c2   :  { %v1298_v20 = vpop.f32.mrb[31].mxu0 }
 0x1c3   :  { %v1015_v21 = vmax.f32 %v1013_v13, %v1014_v17  ;;  %v931_v63 = vadd.f32 %v1296_v18, %v1964_v59  ;;  %v1299_v22 = vadd.f32 %v1298_v20, %v1297_v19  ;;  %v1071_v0 = vunpack.c.l.b16 %v1032_v16 }
 0x1c5   :  { %v1016_v23 = vrot.slane %v1015_v21, 2  ;;  %v951_v25 = vmax.f32 %v931_v63, 0.0  ;;  %v934_v62 = vadd.f32 %v1299_v22, %v1964_v59  ;;  %v1083_v26 = vsel %vm1082_vm15, %v1071_v0, %v1081_v9 }
 0x1c7   :  { %v1017_v29 = vmax.f32 %v1015_v21, %v1016_v23  ;;  %v952_v30 = vmax.f32 %v934_v62, 0.0  ;;  %v969_v33 = vmul.f32 %v1968_v51, %v951_v25  ;;  %v1227_v51 = vld [vmem:[%s2022_s5] ss:$0 sm:$0xff] }
 0x1c9   :  { %v1018_v31 = vrot.slane %v1017_v29, 1  ;;  %v970_v34 = vmul.f32 %v1970_v5, %v952_v30 }
 0x1cb   :  { %v1020_v35 = vmax.f32 %v969_v33, %v970_v34  ;;  %v1019_v36 = vmax.f32 %v1017_v29, %v1018_v31 }
 0x1cd   :  { %v1021_v37 = vrot.slane %v1020_v35, 4  ;;  %v1033_v50 = vpack.c.bf16 %v1019_v36, %v1019_v36 }
 0x1cf   :  { %v1022_v28 = vmax.f32 %v1020_v35, %v1021_v37  ;;  %v1072_v40 = vunpack.c.l.b16 %v1033_v50 }
 0x1d1   :  { %v1023_v4 = vrot.slane %v1022_v28, 2  ;;  %v1085_v39 = vsel %vm1084_vm0, %v1072_v40, %v1083_v26 }
 0x1d3   :  { %v1024_v42 = vmax.f32 %v1022_v28, %v1023_v4 }
 0x1d5   :  { %v1025_v55 = vrot.slane %v1024_v42, 1 }
 0x1d7   :  { %v1026_v59 = vmax.f32 %v1024_v42, %v1025_v55 }
 0x1d9   :  { %v1034_v43 = vpack.c.bf16 %v1026_v59, %v1026_v59 }
 0x1db   :  { %v1073_v44 = vunpack.c.l.b16 %v1034_v43 }
 0x1dd   :  { %v1087_v45 = vsel %vm1086_vm1, %v1073_v44, %v1085_v39 }
 0x1de   :  { %v1088_v46 = vpack.c.b16 %v1087_v45, %v1087_v45 }
 0x1e0   :  { %1326 = vmatmul.mubr.bf16.vlgmr.msra.gmra.mrb[0].mxu1 %v1088_v46 }
 0x2b3   :  { %v1172_v5 = vpop.f32.mrb[0].mxu1 }
 0x2b4   :  { %v1173_v27 = vadd.f32 %v1227_v51, %v1172_v5  ;;  %v1327_v8 = vpop.f32.mrb[1].mxu1 }
 0x2b5   :  { %v1175_v47 = vpop.f32.mrb[2].mxu1 }
 0x2b6   :  { %1178 = vst [vmem:[#allocation5] sm:$0xff] %v1173_v27  ;;  %v1328_v48 = vpop.f32.mrb[3].mxu1 }
 0x2b7   :  { %1411 = shalt.err (!%p1408_p12)
}
 0x2b8   :  { %s1412_s5 = scalar_lea.hbm %s2023_s6, 128 }
 0x2b9   :  { %p1413_p13 = scmp.ne.s32.totalorder %s2023_s6, %s1412_s5  ;;  %p1416_p0 = scmp.lt.u32.totalorder %s1412_s5, %s2023_s6 }
 0x2bb   :  { %p1418_p1 = pnand %p1416_p0, %p1413_p13 }
 0x2bd   :  { %1421 = shalt.err (!%p1418_p1)
}
 0x2be   :  { %1188 = dma.vmem_to_hbm [thread:$0]  %s1186_s23, 128, %s2023_s6, [#allocation4]  }
 0x2bf   :  { %1424 = dma.done.wait [#allocation4], 128  }
 0x2c0   :  { %1425 = vsyncadd [#allocation4], 4294967168 }
 0x2c1   :  { %1192 = vsyncpa [#allocation3], 1 }
 0x2c2   :  { %1193 = vsyncpa [#allocation4], 1 }

</bundles_post_ra>
